<compile_context>
chip_gen: v6e
topology: v6e:2x2x1
jax: 0.10.0
libtpu: 0.0.40
codegen_flags: <defaults>
</compile_context>

<pallas_src>
import jax
import jax.numpy as jnp
from jax.experimental import pallas as pl
from jax.experimental.pallas import tpu as pltpu

_HALO_BLOCK = 128  # lane-dense halo tile width; requires K - 1 <= 128


def _round_up(a, b):
    return ((a + b - 1) // b) * b


def _dws_conv_kernel(x_ref, halo_ref, wdw_ref, wpw_ref, bias_ref, o_ref, slab_ref):
    # x_ref   : (C, L_tile)        current length tile of the input
    # halo_ref: (C, 128)           next 128 input columns (covers the K-1 tail)
    # wdw_ref : (C, K)             depthwise weights (PyTorch (C,1,K) squeezed)
    # wpw_ref : (C, C)             pointwise 1x1 weights (PyTorch (C,C,1) squeezed)
    # bias_ref: (C, 1)             fused bias = Wpw @ b_dw + b_pw, float32
    # o_ref   : (C, L_tile)
    # slab_ref: (C, L_tile + 128)  f32 staging slab (VMEM scratch)
    c_out, l_tile = o_ref.shape
    k = wdw_ref.shape[1]

    # Stage the extended window once (cast-and-store each piece exactly once);
    # the K shifted reads below are lane realigns of this in-VMEM slab.
    slab_ref[:, :l_tile] = x_ref[...].astype(jnp.float32)
    slab_ref[:, l_tile:] = halo_ref[...].astype(jnp.float32)

    w = wdw_ref[...].astype(jnp.float32)

    # Depthwise conv: acc[c, t] = sum_j w[c, j] * x[c, t + j]   (f32 accumulation, VPU)
    acc = w[:, 0:1] * slab_ref[:, 0:l_tile]
    for j in range(1, k):  # K is a small static constant -> fully unrolled
        acc = acc + w[:, j:j + 1] * slab_ref[:, j:j + l_tile]

    if c_out <= 64:
        # Tiny channel counts under-utilize the MXU (<1%): unrolled broadcast-MACs
        # keep the pointwise conv on the VPU and entirely in f32.
        wpw = wpw_ref[...].astype(jnp.float32)
        z = bias_ref[...] + wpw[:, 0:1] * acc[0:1, :]
        for c in range(1, c_out):
            z = z + wpw[:, c:c + 1] * acc[c:c + 1, :]
    else:
        # Pointwise (1x1) conv as an MXU matmul over channels. Keeps bf16 MXU
        # operands when the weights are supplied in bf16 (adds one rounding step
        # vs. the f32 PyTorch reference — acceptable, documented).
        wpw = wpw_ref[...]
        y = acc if wpw.dtype == jnp.float32 else acc.astype(wpw.dtype)
        z = jnp.dot(wpw, y, preferred_element_type=jnp.float32) + bias_ref[...]

    o_ref[...] = z.astype(o_ref.dtype)


def depthwise_separable_conv1d(x, w_dw, b_dw, w_pw, b_pw, *, l_tile=None):
    """x: (B, C_in, L). Weights in PyTorch Conv1d shapes:
       w_dw: (C_out, 1, K) depthwise (groups=C_in), b_dw: (C_out,)
       w_pw: (C_out, C_out, 1) pointwise,           b_pw: (C_out,)
    Returns: (B, C_out, L - K + 1)."""
    B, C_in, L = x.shape
    C_out, _, K = w_dw.shape
    assert C_out % C_in == 0
    assert K - 1 <= _HALO_BLOCK, "halo block only covers K <= 129"
    mult = C_out // C_in
    L_out = L - K + 1
    assert L_out >= 1

    if mult > 1:
        # TODO(synk): replicate input channels inside the kernel (VMEM-side) instead
        # of in HBM; SpEx+ uses out_channels == in_channels so this path is cold.
        x = jnp.repeat(x, mult, axis=1)

    itemsize = jnp.dtype(x.dtype).itemsize

    # ---- Length-tile sizing ------------------------------------------------
    # Target ~2 MiB per (C, l_tile) input block so DMAs run near the HBM
    # roofline even for small channel counts; clamp to what the sequence needs,
    # keep blocks inside the unpadded array when L >= 128, and keep >= 2 grid
    # steps when B == 1 so both v7x TensorCores get work.
    if l_tile is None:
        target_bytes = 2 * 2**20
        l_tile = max(_HALO_BLOCK, target_bytes // max(1, C_out * itemsize))
    l_tile = max(_HALO_BLOCK, min(int(l_tile), 32768))
    l_tile = _round_up(l_tile, _HALO_BLOCK)
    l_tile = min(l_tile, _round_up(L_out, _HALO_BLOCK))
    if L >= _HALO_BLOCK:
        l_tile = min(l_tile, (L // _HALO_BLOCK) * _HALO_BLOCK)
    if B == 1 and L_out > _HALO_BLOCK:
        l_tile = min(l_tile, _round_up(pl.cdiv(L_out, 2), _HALO_BLOCK))
    l_tile = max(_HALO_BLOCK, l_tile)
    n_l = pl.cdiv(L_out, l_tile)

    halo_stride = l_tile // _HALO_BLOCK
    # Last 128-lane block whose start is still inside the (unpadded) input; the
    # halo index is clamped to it.  Whenever the clamp changes the index, the
    # halo data only feeds output columns >= L_out, which the masked boundary
    # store discards — so no OOB block reads and no correctness impact.
    max_halo_blk = max(0, (L - 1) // _HALO_BLOCK)

    # Squeeze weights to 2-D tiles; fold depthwise bias through the linear 1x1 conv.
    wdw2 = w_dw[:, 0, :]                                               # (C_out, K)
    wpw2 = w_pw[:, :, 0]                                               # (C_out, C_out)
    b_fused = (jnp.dot(wpw2.astype(jnp.float32), b_dw.astype(jnp.float32))
               + b_pw.astype(jnp.float32))[:, None]                    # (C_out, 1) f32

    # ---- Generation-aware VMEM budget ---------------------------------------
    # Double buffers for all five inputs + output, f32 staging slab scratch and
    # f32 temporaries; cap at 65% of physical VMEM (~41 MiB on v7x's 64 MiB,
    # ~83 MiB on v5e/v6e's 128 MiB).
    est = (2 * C_out * l_tile * itemsize                  # x blocks (x2 buffers)
           + 2 * C_out * _HALO_BLOCK * itemsize           # halo blocks
           + 2 * C_out * (C_out + K + 1) * 4              # wdw + wpw + bias
           + 2 * C_out * l_tile * itemsize                # output blocks
           + C_out * (l_tile + _HALO_BLOCK) * 4           # f32 staging slab
           + 3 * C_out * l_tile * 4)                      # f32 acc/z temporaries
    try:
        phys_vmem = pltpu.get_tpu_info().vmem_capacity_bytes
    except Exception:
        phys_vmem = 64 * 2**20  # conservative (v7x)
    vmem_limit = int(min(max(est * 1.25, 16 * 2**20), int(phys_vmem * 0.65)))

    out = pl.pallas_call(
        _dws_conv_kernel,
        out_shape=jax.ShapeDtypeStruct((B, C_out, L_out), x.dtype),
        grid_spec=pltpu.PrefetchScalarGridSpec(
            num_scalar_prefetch=0,
            grid=(B, n_l),
            in_specs=[
                # current length tile (last block may be a partial boundary read)
                pl.BlockSpec((None, C_out, l_tile), lambda b, l: (b, 0, l)),
                # 128-lane halo = first columns of the next tile (same HBM array),
                # clamped to the last in-bounds 128-block.
                pl.BlockSpec(
                    (None, C_out, _HALO_BLOCK),
                    lambda b, l: (b, 0,
                                  jnp.minimum((l + 1) * halo_stride, max_halo_blk))),
                pl.BlockSpec((C_out, K), lambda b, l: (0, 0)),
                pl.BlockSpec((C_out, C_out), lambda b, l: (0, 0)),
                pl.BlockSpec((C_out, 1), lambda b, l: (0, 0)),
            ],
            out_specs=pl.BlockSpec((None, C_out, l_tile), lambda b, l: (b, 0, l)),
            scratch_shapes=[
                pltpu.VMEM((C_out, l_tile + _HALO_BLOCK), jnp.float32),
            ],
        ),
        compiler_params=pltpu.CompilerParams(
            dimension_semantics=("parallel", "parallel"),
            vmem_limit_bytes=vmem_limit,
        ),
    )(x, x, wdw2, wpw2, b_fused)

    return out


def _reference(x, w_dw, b_dw, w_pw, b_pw):
    """Plain-JAX reference matching PyTorch Conv1d semantics (for verification)."""
    C_out, _, K = w_dw.shape
    C_in = x.shape[1]
    mult = C_out // C_in
    x_exp = jnp.repeat(x, mult, axis=1) if mult > 1 else x
    L_out = x.shape[2] - K + 1
    y = jnp.zeros((x.shape[0], C_out, L_out), jnp.float32)
    for j in range(K):
        y = y + (w_dw[None, :, 0, j, None].astype(jnp.float32)
                 * x_exp[:, :, j:j + L_out].astype(jnp.float32))
    y = y + b_dw[None, :, None].astype(jnp.float32)
    z = (jnp.einsum("oc,bcl->bol", w_pw[:, :, 0].astype(jnp.float32), y)
         + b_pw[None, :, None].astype(jnp.float32))
    return z.astype(x.dtype)


if __name__ == "__main__":
    key = jax.random.PRNGKey(0)
    k_x, k_wdw, k_bdw, k_wpw, k_bpw = jax.random.split(key, 5)

    B, C_in, L = 2, 8, 300
    C_out, K = 8, 3   # out_channels defaults to in_channels

    x = jax.random.normal(k_x, (B, C_in, L), dtype=jnp.float32)
    w_dw = jax.random.normal(k_wdw, (C_out, 1, K), dtype=jnp.float32) * 0.1
    b_dw = jax.random.normal(k_bdw, (C_out,), dtype=jnp.float32) * 0.1
    w_pw = jax.random.normal(k_wpw, (C_out, C_out, 1), dtype=jnp.float32) * 0.1
    b_pw = jax.random.normal(k_bpw, (C_out,), dtype=jnp.float32) * 0.1

    ref = _reference(x, w_dw, b_dw, w_pw, b_pw)

    # Default tiling (auto-sized l_tile, partial boundary blocks, no padding).
    out = depthwise_separable_conv1d(x, w_dw, b_dw, w_pw, b_pw)
    out = jax.block_until_ready(out)
    assert out.shape == (B, C_out, L - K + 1), out.shape
    assert jnp.allclose(out, ref, atol=1e-5, rtol=1e-5), "mismatch (default tile)"

    # Multi-tile path exercising the halo across tile boundaries + clamped halo
    # on the last (partial) tile.
    out_t = depthwise_separable_conv1d(x, w_dw, b_dw, w_pw, b_pw, l_tile=128)
    out_t = jax.block_until_ready(out_t)
    assert jnp.allclose(out_t, ref, atol=1e-5, rtol=1e-5), "mismatch (tiled + halo)"

    # Module default kernel_size=1 (pure depthwise-scale + pointwise stack).
    w_dw1 = jax.random.normal(k_wdw, (C_out, 1, 1), dtype=jnp.float32) * 0.1
    ref1 = _reference(x, w_dw1, b_dw, w_pw, b_pw)
    out1 = jax.block_until_ready(depthwise_separable_conv1d(x, w_dw1, b_dw, w_pw, b_pw))
    assert out1.shape == (B, C_out, L), out1.shape
    assert jnp.allclose(out1, ref1, atol=1e-5, rtol=1e-5), "mismatch (K=1)"

    print("KERNEL_OK")
</pallas_src>

<mosaic_0001>
module attributes {stable_mosaic.version = 11 : i64} {
  func.func @_dws_conv_kernel(%arg0: i32, %arg1: i32, %arg2: memref<1x8x256xf32, #tpu.memory_space<vmem>>, %arg3: memref<1x8x128xf32, #tpu.memory_space<vmem>>, %arg4: memref<8x3xf32, #tpu.memory_space<vmem>>, %arg5: memref<8x8xf32, #tpu.memory_space<vmem>>, %arg6: memref<8x1xf32, #tpu.memory_space<vmem>>, %arg7: memref<1x8x256xf32, #tpu.memory_space<vmem>>, %arg8: memref<8x384xf32, #tpu.memory_space<vmem>>) attributes {dimension_semantics = [#tpu.dimension_semantics<parallel>, #tpu.dimension_semantics<parallel>], iteration_bounds = array<i64: 2, 2>, scalar_prefetch = 0 : i64, scratch_operands = 1 : i64, tpu.core_type = #tpu.core_type<tc>, window_params = [{transform_indices = @transform_0, window_bounds = array<i64: 1, 8, 256>}, {transform_indices = @transform_1, window_bounds = array<i64: 1, 8, 128>}, {pipeline_mode = #tpu.pipeline_mode<synchronous>, transform_indices = @transform_2, window_bounds = array<i64: 8, 3>}, {pipeline_mode = #tpu.pipeline_mode<synchronous>, transform_indices = @transform_3, window_bounds = array<i64: 8, 8>}, {pipeline_mode = #tpu.pipeline_mode<synchronous>, transform_indices = @transform_4, window_bounds = array<i64: 8, 1>}, {transform_indices = @transform_5, window_bounds = array<i64: 1, 8, 256>}]} {
    %c0 = arith.constant 0 : index
    %c0_0 = arith.constant 0 : index
    %c0_1 = arith.constant 0 : index
    %0 = vector.load %arg2[%c0, %c0_0, %c0_1] : memref<1x8x256xf32, #tpu.memory_space<vmem>>, vector<1x8x256xf32>
    %1 = vector.shape_cast %0 : vector<1x8x256xf32> to vector<8x256xf32>
    %c0_2 = arith.constant 0 : index
    %c0_3 = arith.constant 0 : index
    %2 = vector.load %arg8[%c0_2, %c0_3] : memref<8x384xf32, #tpu.memory_space<vmem>>, vector<8x256xf32>
    tpu.vector_store %arg8[%c0_2, %c0_3], %1 {strides = array<i32>} : memref<8x384xf32, #tpu.memory_space<vmem>>, vector<8x256xf32>,
    %c0_4 = arith.constant 0 : index
    %c0_5 = arith.constant 0 : index
    %c0_6 = arith.constant 0 : index
    %3 = vector.load %arg3[%c0_4, %c0_5, %c0_6] : memref<1x8x128xf32, #tpu.memory_space<vmem>>, vector<1x8x128xf32>
    %4 = vector.shape_cast %3 : vector<1x8x128xf32> to vector<8x128xf32>
    %c0_7 = arith.constant 0 : index
    %c256 = arith.constant 256 : index
    %5 = vector.load %arg8[%c0_7, %c256] : memref<8x384xf32, #tpu.memory_space<vmem>>, vector<8x128xf32>
    tpu.vector_store %arg8[%c0_7, %c256], %4 {strides = array<i32>} : memref<8x384xf32, #tpu.memory_space<vmem>>, vector<8x128xf32>,
    %c0_8 = arith.constant 0 : index
    %c0_9 = arith.constant 0 : index
    %6 = vector.load %arg4[%c0_8, %c0_9] : memref<8x3xf32, #tpu.memory_space<vmem>>, vector<8x3xf32>
    %7 = vector.extract_strided_slice %6 {offsets = [0, 0], sizes = [8, 1], strides = [1, 1]} : vector<8x3xf32> to vector<8x1xf32>
    %c0_10 = arith.constant 0 : index
    %c0_11 = arith.constant 0 : index
    %8 = vector.load %arg8[%c0_10, %c0_11] : memref<8x384xf32, #tpu.memory_space<vmem>>, vector<8x256xf32>
    %9 = vector.broadcast %7 : vector<8x1xf32> to vector<8x256xf32>
    %10 = arith.mulf %9, %8 : vector<8x256xf32>
    %11 = vector.extract_strided_slice %6 {offsets = [0, 1], sizes = [8, 1], strides = [1, 1]} : vector<8x3xf32> to vector<8x1xf32>
    %c0_12 = arith.constant 0 : index
    %c1 = arith.constant 1 : index
    %12 = vector.load %arg8[%c0_12, %c1] : memref<8x384xf32, #tpu.memory_space<vmem>>, vector<8x256xf32>
    %13 = vector.broadcast %11 : vector<8x1xf32> to vector<8x256xf32>
    %14 = arith.mulf %13, %12 : vector<8x256xf32>
    %15 = arith.addf %10, %14 : vector<8x256xf32>
    %16 = vector.extract_strided_slice %6 {offsets = [0, 2], sizes = [8, 1], strides = [1, 1]} : vector<8x3xf32> to vector<8x1xf32>
    %c0_13 = arith.constant 0 : index
    %c2 = arith.constant 2 : index
    %17 = vector.load %arg8[%c0_13, %c2] : memref<8x384xf32, #tpu.memory_space<vmem>>, vector<8x256xf32>
    %18 = vector.broadcast %16 : vector<8x1xf32> to vector<8x256xf32>
    %19 = arith.mulf %18, %17 : vector<8x256xf32>
    %20 = arith.addf %15, %19 : vector<8x256xf32>
    %c0_14 = arith.constant 0 : index
    %c0_15 = arith.constant 0 : index
    %21 = vector.load %arg5[%c0_14, %c0_15] : memref<8x8xf32, #tpu.memory_space<vmem>>, vector<8x8xf32>
    %c0_16 = arith.constant 0 : index
    %c0_17 = arith.constant 0 : index
    %22 = vector.load %arg6[%c0_16, %c0_17] : memref<8x1xf32, #tpu.memory_space<vmem>>, vector<8x1xf32>
    %23 = vector.extract_strided_slice %21 {offsets = [0, 0], sizes = [8, 1], strides = [1, 1]} : vector<8x8xf32> to vector<8x1xf32>
    %24 = vector.extract_strided_slice %20 {offsets = [0, 0], sizes = [1, 256], strides = [1, 1]} : vector<8x256xf32> to vector<1x256xf32>
    %25 = vector.broadcast %23 : vector<8x1xf32> to vector<8x256xf32>
    %26 = vector.broadcast %24 : vector<1x256xf32> to vector<8x256xf32>
    %27 = arith.mulf %25, %26 : vector<8x256xf32>
    %28 = vector.broadcast %22 : vector<8x1xf32> to vector<8x256xf32>
    %29 = arith.addf %28, %27 : vector<8x256xf32>
    %30 = vector.extract_strided_slice %21 {offsets = [0, 1], sizes = [8, 1], strides = [1, 1]} : vector<8x8xf32> to vector<8x1xf32>
    %31 = vector.extract_strided_slice %20 {offsets = [1, 0], sizes = [1, 256], strides = [1, 1]} : vector<8x256xf32> to vector<1x256xf32>
    %32 = vector.broadcast %30 : vector<8x1xf32> to vector<8x256xf32>
    %33 = vector.broadcast %31 : vector<1x256xf32> to vector<8x256xf32>
    %34 = arith.mulf %32, %33 : vector<8x256xf32>
    %35 = arith.addf %29, %34 : vector<8x256xf32>
    %36 = vector.extract_strided_slice %21 {offsets = [0, 2], sizes = [8, 1], strides = [1, 1]} : vector<8x8xf32> to vector<8x1xf32>
    %37 = vector.extract_strided_slice %20 {offsets = [2, 0], sizes = [1, 256], strides = [1, 1]} : vector<8x256xf32> to vector<1x256xf32>
    %38 = vector.broadcast %36 : vector<8x1xf32> to vector<8x256xf32>
    %39 = vector.broadcast %37 : vector<1x256xf32> to vector<8x256xf32>
    %40 = arith.mulf %38, %39 : vector<8x256xf32>
    %41 = arith.addf %35, %40 : vector<8x256xf32>
    %42 = vector.extract_strided_slice %21 {offsets = [0, 3], sizes = [8, 1], strides = [1, 1]} : vector<8x8xf32> to vector<8x1xf32>
    %43 = vector.extract_strided_slice %20 {offsets = [3, 0], sizes = [1, 256], strides = [1, 1]} : vector<8x256xf32> to vector<1x256xf32>
    %44 = vector.broadcast %42 : vector<8x1xf32> to vector<8x256xf32>
    %45 = vector.broadcast %43 : vector<1x256xf32> to vector<8x256xf32>
    %46 = arith.mulf %44, %45 : vector<8x256xf32>
    %47 = arith.addf %41, %46 : vector<8x256xf32>
    %48 = vector.extract_strided_slice %21 {offsets = [0, 4], sizes = [8, 1], strides = [1, 1]} : vector<8x8xf32> to vector<8x1xf32>
    %49 = vector.extract_strided_slice %20 {offsets = [4, 0], sizes = [1, 256], strides = [1, 1]} : vector<8x256xf32> to vector<1x256xf32>
    %50 = vector.broadcast %48 : vector<8x1xf32> to vector<8x256xf32>
    %51 = vector.broadcast %49 : vector<1x256xf32> to vector<8x256xf32>
    %52 = arith.mulf %50, %51 : vector<8x256xf32>
    %53 = arith.addf %47, %52 : vector<8x256xf32>
    %54 = vector.extract_strided_slice %21 {offsets = [0, 5], sizes = [8, 1], strides = [1, 1]} : vector<8x8xf32> to vector<8x1xf32>
    %55 = vector.extract_strided_slice %20 {offsets = [5, 0], sizes = [1, 256], strides = [1, 1]} : vector<8x256xf32> to vector<1x256xf32>
    %56 = vector.broadcast %54 : vector<8x1xf32> to vector<8x256xf32>
    %57 = vector.broadcast %55 : vector<1x256xf32> to vector<8x256xf32>
    %58 = arith.mulf %56, %57 : vector<8x256xf32>
    %59 = arith.addf %53, %58 : vector<8x256xf32>
    %60 = vector.extract_strided_slice %21 {offsets = [0, 6], sizes = [8, 1], strides = [1, 1]} : vector<8x8xf32> to vector<8x1xf32>
    %61 = vector.extract_strided_slice %20 {offsets = [6, 0], sizes = [1, 256], strides = [1, 1]} : vector<8x256xf32> to vector<1x256xf32>
    %62 = vector.broadcast %60 : vector<8x1xf32> to vector<8x256xf32>
    %63 = vector.broadcast %61 : vector<1x256xf32> to vector<8x256xf32>
    %64 = arith.mulf %62, %63 : vector<8x256xf32>
    %65 = arith.addf %59, %64 : vector<8x256xf32>
    %66 = vector.extract_strided_slice %21 {offsets = [0, 7], sizes = [8, 1], strides = [1, 1]} : vector<8x8xf32> to vector<8x1xf32>
    %67 = vector.extract_strided_slice %20 {offsets = [7, 0], sizes = [1, 256], strides = [1, 1]} : vector<8x256xf32> to vector<1x256xf32>
    %68 = vector.broadcast %66 : vector<8x1xf32> to vector<8x256xf32>
    %69 = vector.broadcast %67 : vector<1x256xf32> to vector<8x256xf32>
    %70 = arith.mulf %68, %69 : vector<8x256xf32>
    %71 = arith.addf %65, %70 : vector<8x256xf32>
    %c0_18 = arith.constant 0 : index
    %c0_19 = arith.constant 0 : index
    %c0_20 = arith.constant 0 : index
    %72 = vector.load %arg7[%c0_18, %c0_19, %c0_20] : memref<1x8x256xf32, #tpu.memory_space<vmem>>, vector<1x8x256xf32>
    %73 = vector.shape_cast %72 : vector<1x8x256xf32> to vector<8x256xf32>
    %74 = vector.shape_cast %71 : vector<8x256xf32> to vector<1x8x256xf32>
    tpu.vector_store %arg7[%c0_18, %c0_19, %c0_20], %74 {strides = array<i32>} : memref<1x8x256xf32, #tpu.memory_space<vmem>>, vector<1x8x256xf32>,
    return
  }
  func.func @transform_0(%arg0: i32, %arg1: i32) -> (i32, i32, i32) {
    %c0_i32 = arith.constant 0 : i32
    %c0_i32_0 = arith.constant 0 : i32
    return %arg0, %c0_i32, %arg1 : i32, i32, i32
  }
  func.func @transform_1(%arg0: i32, %arg1: i32) -> (i32, i32, i32) {
    %c1_i32 = arith.constant 1 : i32
    %0 = arith.addi %arg1, %c1_i32 : i32
    %c2_i32 = arith.constant 2 : i32
    %1 = arith.muli %0, %c2_i32 : i32
    %c2_i32_0 = arith.constant 2 : i32
    %2 = arith.minsi %1, %c2_i32_0 : i32
    %c0_i32 = arith.constant 0 : i32
    %c0_i32_1 = arith.constant 0 : i32
    return %arg0, %c0_i32, %2 : i32, i32, i32
  }
  func.func @transform_2(%arg0: i32, %arg1: i32) -> (i32, i32) {
    %c0_i32 = arith.constant 0 : i32
    %c0_i32_0 = arith.constant 0 : i32
    %c0_i32_1 = arith.constant 0 : i32
    return %c0_i32, %c0_i32_0 : i32, i32
  }
  func.func @transform_3(%arg0: i32, %arg1: i32) -> (i32, i32) {
    %c0_i32 = arith.constant 0 : i32
    %c0_i32_0 = arith.constant 0 : i32
    %c0_i32_1 = arith.constant 0 : i32
    return %c0_i32, %c0_i32_0 : i32, i32
  }
  func.func @transform_4(%arg0: i32, %arg1: i32) -> (i32, i32) {
    %c0_i32 = arith.constant 0 : i32
    %c0_i32_0 = arith.constant 0 : i32
    %c0_i32_1 = arith.constant 0 : i32
    return %c0_i32, %c0_i32_0 : i32, i32
  }
  func.func @transform_5(%arg0: i32, %arg1: i32) -> (i32, i32, i32) {
    %c0_i32 = arith.constant 0 : i32
    %c0_i32_0 = arith.constant 0 : i32
    return %arg0, %c0_i32, %arg1 : i32, i32, i32
  }
}

</mosaic_0001>

<bundles_post_ra>
// kernel: tpu_custom_call.1
= control target key start
LH: loop header
LB: loop body
LE: loop exit
PB: predicated region body
PF: predicated region fallthrough
CT: control target
= control target key end

     0   :  { %s1334_s0 = inlined_call_operand.hbm [shape: f32[2,8,300], index: 0, kind: input, shape index: {}]   ;;  %s1335_s1 = inlined_call_operand.hbm [shape: f32[2,8,300], index: 1, kind: input, shape index: {}]   ;;  %s1336_s2 = inlined_call_operand.vmem [shape: f32[8,3], index: 2, kind: input, shape index: {}]   ;;  %s1337_s3 = inlined_call_operand.vmem [shape: f32[8,8], index: 3, kind: input, shape index: {}]   ;;  %s1338_s4 = inlined_call_operand.vmem [shape: f32[8,1], index: 4, kind: input, shape index: {}]   ;;  %s1339_s5 = inlined_call_operand.hbm [shape: f32[2,8,298], index: 5, kind: output, shape index: {}]  }
   0x1   :  { %1348 = sst [smem:[#allocation20_spill]] %s1339_s5 }
   0x2   :  { %10 = vsyncpa [#allocation4], 0 }
   0x3   :  { %12 = vsyncpa [#allocation4 + $0x1], 0 }
   0x4   :  { %13 = vsyncpa [#allocation7], 0 }
   0x5   :  { %15 = vsyncpa [#allocation7 + $0x1], 0 }
   0x6   :  { %16 = vsyncpa [#allocation5], 0 }
   0x7   :  { %18 = vsyncpa [#allocation5 + $0x1], 0  ;;  %s1051_s18 = smov 0   ;;  %s1053_s19 = smov 0  }
   0x8   :  { %s1055_s20 = smov 0   ;;  %s1057_s21 = smov 0  }
   0x9   :  { %s1059_s22 = smov 0   ;;  %s1061_s23 = smov 0  }
   0xa   :  { %s1063_s24 = smov 0   ;;  %s1065_s25 = smov 0  }
   0xb   :  { %s1067_s26 = smov 0   ;;  %s1069_s27 = smov 0  }
   0xc   :  { %s1071_s28 = smov 0  }
   0xd LB: > { %1349 = sst [smem:[#allocation12_spill]] %s978_s21  ;;  %s670_s29 = sadd.s32 4294967295, %s1006_s28   ;;  %s1006_s28 = sphi %s1071_s28, %s24_s28   ;;  %s1002_s27 = sphi %s1069_s27, %s1385_s27   ;;  %s998_s26 = sphi %s1067_s26, %s1384_s26   ;;  %s994_s25 = sphi %s1065_s25, %s1383_s25   ;;  %s990_s24 = sphi %s1063_s24, %s1382_s24   ;;  %s986_s23 = sphi %s1061_s23, %s1374_s23   ;;  %s982_s22 = sphi %s1059_s22, %s1381_s22   ;;  %s978_s21 = sphi %s1057_s21, %s1380_s21   ;;  %s974_s20 = sphi %s1055_s20, %s1379_s20   ;;  %s970_s19 = sphi %s1053_s19, %s1378_s19   ;;  %s966_s18 = sphi %s1051_s18, %s1377_s18  }
   0xe   : > { %1350 = sst [smem:[#allocation13_spill]] %s986_s23  ;;  %s671_s30 = sadd.s32 4294967294, %s1006_s28  }
   0xf   : > { %1351 = sst [smem:[#allocation14_spill]] %s994_s25  ;;  %s33_s6 = sadd.s32 1, %s998_s26 }
  0x10   : > { %s36_s7 = sadd.s32 1, %s1002_s27  ;;  %p34_p0 = scmp.ge.s32.totalorder %s33_s6, 2 }
  0x11   : > { %s45_s8 = sadd.s32 1, %s986_s23  ;;  %p52_p1 = scmp.ne.s32.totalorder %s986_s23, %s982_s22 }
  0x12   : > { %p53_p2 = scmp.eq.s32.totalorder %s1006_s28, 0  ;;  %s1387_s6 = smov (%p34_p0, %s33_s6), 0 }
  0x13   : > { %1352 = sst [smem:[#allocation15_spill]] %s1387_s6  ;;  %s1389_s7 = smov (!%p34_p0, %s36_s7), %s1002_s27 }
  0x14   : > { %s41_s9 = ssub.s32 %s998_s26, %s1387_s6  ;;  %p1124_p3 = por %p53_p2, %p52_p1 }
  0x15   : > { %p38_p4 = scmp.ge.s32.totalorder %s1389_s7, 2  ;;  %p1340_p5 = scmp.ne.s32.totalorder %s982_s22, %s978_s21 }
  0x16   : > { %p59_p6 = scmp.eq.s32.totalorder %s670_s29, 0  ;;  %s81_s16 = sadd.s32 1, %s974_s20 }
  0x17   : > { %s1391_s7 = smov (%p38_p4, %s1389_s7), 0  ;;  %p88_p9 = scmp.ne.s32.totalorder %s974_s20, %s970_s19 }
  0x18   : > { %1354 = sst [smem:[#allocation16_spill]] %s1391_s7  ;;  %p1136_p7 = por %p59_p6, %p1340_p5 }
  0x19   : > { %s40_s13 = ssub.s32 %s1002_s27, %s1391_s7  ;;  %p94_p10 = scmp.ne.s32.totalorder %s970_s19, %s966_s18 }
  0x1a   : > { %s1355_s12 = scalar_select %p1136_p7, 1, 0 }
  0x1b   : > { %s42_s14 = sor.u32 %s41_s9, %s40_s13  ;;  %p1152_p11 = por %p88_p9, %p53_p2 }
  0x1c   : > { %p43_p8 = scmp.eq.s32.totalorder %s42_s14, 0  ;;  %p1156_p12 = por %p94_p10, %p59_p6 }
  0x1d   : > { %p183_p13 = scmp.eq.s32.totalorder %s670_s29, 3  ;;  %p189_p0 = scmp.eq.s32.totalorder %s671_s30, 3 }
  0x1e   : > { %s1143_s15 = scalar_select %p43_p8, %s986_s23, %s45_s8  }
  0x1f   : > { %p79_p4 = scmp.eq.s32.totalorder %s40_s13, 0  ;;  %p1163_p5 = por %p183_p13, %p52_p1 }
  0x20   : > { %1356 = sst [smem:[#allocation17_spill]] %s1143_s15  ;;  %p1360_p8 = scmp.ne.s32.totalorder %s982_s22, %s978_s21 }
  0x21   : > { %s1175_s8 = scalar_select %p79_p4, %s974_s20, %s81_s16  }
  0x22   : > { %p1170_p7 = por %p189_p0, %p1360_p8  ;;  %p675_p2 = scmp.ge.s32.totalorder %s1006_s28, 4 }
  0x23   : > { %1363 = sst [smem:[#allocation19_spill]] %s1175_s8 }
  0x24   : > { %s1361_s18 = scalar_select %p1170_p7, 1, 0 }
  0x25   : > { %214 = sbr.rel (%p675_p2) target bundleno = 101 (0x65), region = 28 }
  0x26   : > { %1362 = sst [smem:[#allocation18_spill]] %s1361_s18 }
  0x2a   : > { %217 = sbr.rel (!%p1124_p3) target bundleno = 76 (0x4c), region = 32  ;;  %s218_s29 = sand.u32 (%p1124_p3), 1, %s986_s23  }
  0x2b   : > { %s1364_s30 = sshll.u32 (%p1124_p3), %s998_s26, 1  ;;  %s676_s14 = sshll.u32 (%p1124_p3), %s218_s29, 4 }
  0x2c   : > { %s224_s13 = ssub.s32 (%p1124_p3), 3, %s1364_s30  ;;  %s1186_s16 = scalar_lea.sflag (%p1124_p3), [#allocation4], %s218_s29 }
  0x2d   : > { %p225_p1 = scmp.lt.s32.totalorder (%p1124_p3), %s224_s13, 2  ;;  %s222_s15 = scalar_lea.vmem (%p1124_p3), [#allocation3], %s676_s14 }
  0x2f   : > { %s1393_s13 = smov (!%p225_p1, %s224_s13), 2 }
  0x30   : > { %s1183_s7 = sshll.u32 %s1393_s13, 7 }
  0x31   : > { %s229_s6 = ssub.s32 256, %s1183_s7 }
  0x32   : > { %230 = vsyncadd %s1186_s16, %s229_s6  ;;  %s705_s10 = smul.u32 3, %s1002_s27  ;;  %p679_p3 = scmp.ne.s32.totalorder %s1183_s7, 0 }
  0x33   : > { %s238_s30 = sshll.u32 %s222_s15, 4  ;;  %s1365_s23 = sshll.u32 %s998_s26, 1  ;;  %s239_s30 = int_to_ptr.vmem [resolvable:$true] %s238_s30 }
  0x34   : > { %s233_s8 = sadd.s32 %s705_s10, %s1365_s23  ;;  %s831_s25 = scalar_lea.hbm %s1334_s0, 768 }
  0x35   : > { %s680_s13 = sshll.u32 %s233_s8, 7 }
  0x36   : > { %s235_s29 = scalar_lea.hbm %s1334_s0, %s680_s13 }
  0x37   : > { %s827_s5 = scalar_lea.hbm %s235_s29, %s1183_s7 }
  0x38   : > { %p828_p6 = scmp.ne.s32.totalorder %s235_s29, %s827_s5  ;;  %p833_p13 = scmp.lt.s32.totalorder %s831_s25, %s827_s5 }
  0x3a   : > { %p829_p9 = pnand %p828_p6, %p679_p3 }
  0x3c   : > { %p830_p10 = pneg %p829_p9 }
  0x3e   : > { %p835_p0 = pnand %p833_p13, %p830_p10 }
  0x40   : > { %838 = shalt.err (!%p835_p0)
}
  0x41   : > { %s839_s23 = scalar_lea.vmem %s239_s30, %s1183_s7  ;;  %s1008_s21 = smov [#allocation3]  }
  0x42   : > { %p840_p4 = scmp.ne.s32.totalorder %s239_s30, %s839_s23  ;;  %s843_s15 = sshll.u32 %s1008_s21, 4  ;;  %s844_s15 = int_to_ptr.vmem [resolvable:$false] %s843_s15 }
  0x43   : > { %s845_s18 = scalar_lea.vmem %s844_s15, 512  ;;  %p846_p1 = scmp.lt.s32.totalorder %s239_s30, %s844_s15 }
  0x44   : > { %p841_p8 = pnand %p840_p4, %p679_p3  ;;  %p847_p6 = scmp.lt.s32.totalorder %s845_s18, %s839_s23 }
  0x46   : > { %p842_p2 = pneg %p841_p8  ;;  %p848_p9 = por %p847_p6, %p846_p1 }
  0x48   : > { %p849_p7 = pnand %p848_p9, %p842_p2 }
  0x4a   : > { %852 = shalt.err (!%p849_p7)
}
  0x4b   : > { %241 = dma.hbm_to_vmem [thread:$0]  (%p679_p3), %s235_s29, %s1183_s7, %s239_s30, %s1186_s16  }
  0x4c PF: > { %s245_s5 = sand.u32 1, %s974_s20   ;;  %s963_s8 = smul.u32 384, %s1002_s27 }
  0x4d   : > { %s683_s25 = sshll.u32 %s245_s5, 3  ;;  %s246_s15 = scalar_lea.sflag [#allocation7], %s245_s5 }
  0x4e   : > { %s962_s10 = sadd.s32 256, %s963_s8  ;;  %s249_s13 = scalar_lea.vmem [#allocation6], %s683_s25 }
  0x4f   : > { %s262_s6 = sshll.u32 %s249_s13, 4  ;;  %s260_s21 = scalar_lea.hbm %s1335_s1, %s962_s10  ;;  %s263_s6 = int_to_ptr.vmem [resolvable:$true] %s262_s6 }
  0x50   : > { %s853_s18 = scalar_lea.hbm %s260_s21, 128  ;;  %s857_s30 = scalar_lea.hbm %s1335_s1, 768 }
  0x51   : > { %p854_p7 = scmp.ne.s32.totalorder %s260_s21, %s853_s18  ;;  %p859_p13 = scmp.lt.s32.totalorder %s857_s30, %s853_s18 }
  0x53   : > { %p855_p3 = pnand %p854_p7, %p1152_p11 }
  0x55   : > { %p856_p10 = pneg %p855_p3 }
  0x57   : > { %p861_p0 = pnand %p859_p13, %p856_p10 }
  0x59   : > { %864 = shalt.err (!%p861_p0)
}
  0x5a   : > { %s865_s29 = scalar_lea.vmem %s263_s6, 128  ;;  %s1009_s25 = smov [#allocation6]  }
  0x5b   : > { %p866_p4 = scmp.ne.s32.totalorder %s263_s6, %s865_s29  ;;  %s869_s5 = sshll.u32 %s1009_s25, 4  ;;  %s870_s5 = int_to_ptr.vmem [resolvable:$false] %s869_s5 }
  0x5c   : > { %s871_s8 = scalar_lea.vmem %s870_s5, 256  ;;  %p872_p1 = scmp.lt.s32.totalorder %s263_s6, %s870_s5 }
  0x5d   : > { %p867_p8 = pnand %p866_p4, %p1152_p11  ;;  %p873_p6 = scmp.lt.s32.totalorder %s871_s8, %s865_s29 }
  0x5f   : > { %p868_p2 = pneg %p867_p8  ;;  %p874_p9 = por %p873_p6, %p872_p1 }
  0x61   : > { %p875_p7 = pnand %p874_p9, %p868_p2 }
  0x63   : > { %878 = shalt.err (!%p875_p7)
}
  0x64   : > { %708 = dma.hbm_to_vmem [thread:$0]  (%p1152_p11), %s260_s21, 128, %s263_s6, %s246_s15  }
  0x65 PF: > { %p686_p3 = scmp.ge.s32.totalorder %s1006_s28, 1  ;;  %p267_p10 = scmp.lt.s32.totalorder %s1006_s28, 5 }
  0x67   : > { %p268_p13 = pnand %p686_p3, %p267_p10 }
  0x68   : > { %s1226_s10 = sand.u32 (!%p268_p13), 1, %s982_s22   ;;  %p1366_p11 = scmp.ne.s32.totalorder (!%p268_p13), %s1355_s12, 0 }
  0x69   : > { %271 = sbr.rel (%p268_p13) target bundleno = 429 (0x1ad), region = 40  ;;  %s687_s13 = sshll.u32 (!%p268_p13), %s1226_s10, 4 }
  0x6a   : > { %s274_s14 = scalar_lea.sflag (!%p268_p13), [#allocation4], %s1226_s10  ;;  %s1232_s23 = scalar_lea.vmem (!%p268_p13), [#allocation3], %s687_s13 }
  0x6e   : > { %950 = dma.done.wait (%p1366_p11), %s274_s14, 256  }
  0x6f   : > { %952 = vsyncadd (%p1366_p11), %s274_s14, 4294967040  ;;  %s282_s17 = sand.u32 1, %s970_s19  }
  0x70   : > { %s688_s6 = sshll.u32 %s282_s17, 3  ;;  %s283_s21 = scalar_lea.sflag [#allocation7], %s282_s17 }
  0x71   : > { %s286_s15 = scalar_lea.vmem [#allocation6], %s688_s6 }
  0x72   : > { %954 = dma.done.wait (%p1156_p12), %s283_s21, 128  }
  0x73   : > { %956 = vsyncadd (%p1156_p12), %s283_s21, 4294967168  ;;  %v1010_v0 = vmov 1   ;;  %v1011_v1 = vmov 0   ;;  %v338_v2 = vld [vmem:[%s1336_s2] sm:$0xff]  ;;  %v1012_v4 = vmov 2   ;;  %v1013_v6 = vmov 3  }
  0x74   : > { %815 = vset.pattern.permute.xlu0 %v1010_v0  ;;  %817 = vset.pattern.permute.xlu1 %v1011_v1  ;;  %v398_v3 = vld [vmem:[%s1338_s4] sm:$0xff]  ;;  %v333_v12 = vld [vmem:[%s1232_s23 + $0x8] sm:$0xff]  ;;  %s1014_s29 = smov 127   ;;  %s1015_s25 = smov 126   ;;  %v1016_v18 = vmov 5   ;;  %v1017_v19 = vmov 7   ;;  %v404_v27 = vlaneseq }
  0x75   : > { %352 = vperm.xlu0 %815, %v338_v2   ;;  %343 = vperm.xlu1 %817, %v338_v2   ;;  %v397_v5 = vld [vmem:[%s1337_s3] sm:$0xff]  ;;  %v1018_v20 = vmov 4   ;;  %v1019_v21 = vmov 6   ;;  %vm367_vm0 = vcmask 1039360   ;;  %vm390_vm1 = vcmask 1031168   ;;  %s317_s5 = scalar_lea.vmem [#allocation8], %s687_s13 }
  0x76   : > { %v332_v7 = vld [vmem:[%s1232_s23] sm:$0xff]  ;;  %v1254_v31 = vshrl.u32 %v404_v27, 7  ;;  %s536_s8 = scalar_lea.sflag [#allocation5], %s1226_s10  ;;  %s691_s14 = sshll.u32 (%p1163_p5), %s990_s24, 1 }
  0x77   : > { %v336_v8 = vld [vmem:[%s286_s15] sm:$0xff]  ;;  %s544_s23 = ssub.s32 (%p1163_p5), 3, %s691_s14 }
  0x78   : > { %v406_v38 = vsub.s32 0, %v1254_v31  ;;  %v427_v46 = vsub.s32 1, %v1254_v31  ;;  %v443_v50 = vsub.s32 2, %v1254_v31  ;;  %v459_v53 = vsub.s32 3, %v1254_v31  ;;  %p545_p12 = scmp.lt.s32.totalorder (%p1163_p5), %s544_s23, 2 }
  0x79   : > { %816 = vset.pattern.permute.xlu0 %v1012_v4  ;;  %416 = vperm.xlu1 %817, %v398_v3   ;;  %v475_v62 = vsub.s32 4, %v1254_v31 }
  0x7a   : > { %375 = vperm.xlu0 %816, %v338_v2  }
  0x7d   : > { %819 = vset.pattern.permute.xlu1 %v1010_v0 }
  0x7e   : > { %818 = vset.pattern.permute.xlu0 %v1011_v1  ;;  %422 = vperm.xlu1 %819, %v397_v5  }
  0x7f   : > { %401 = vperm.xlu0 %818, %v397_v5  }
  0x82   : > { %821 = vset.pattern.permute.xlu1 %v1013_v6 }
  0x83   : > { %820 = vset.pattern.permute.xlu0 %v1012_v4 }
  0xf0   : > { %v353_v9 = vpop.permute.xlu0 %352  ;;  %v344_v22 = vpop.permute.xlu1 %343 }
  0xf1   : > { %v355_v10 = vmul.f32 %v353_v9, %v332_v7  ;;  %v357_v11 = vmul.f32 %v353_v9, %v336_v8  ;;  %v356_v13 = vmul.f32 %v353_v9, %v333_v12  ;;  %v346_v32 = vmul.f32 %v344_v22, %v332_v7 }
  0xf2   : > { %v347_v39 = vmul.f32 %v344_v22, %v333_v12 }
  0xf3   : > { %365 = vrot.lane.b32.xlu0 %v357_v11, %s1014_s29  ;;  %361 = vrot.lane.b32.xlu1 %v355_v10, %s1014_s29 }
  0xf4   : > { %v417_v23 = vpop.permute.xlu1 %416 }
  0xf5   : > { %v376_v14 = vpop.permute.xlu0 %375 }
  0xf6   : > { %v379_v15 = vmul.f32 %v376_v14, %v333_v12  ;;  %v378_v16 = vmul.f32 %v376_v14, %v332_v7  ;;  %v380_v17 = vmul.f32 %v376_v14, %v336_v8  ;;  %v491_v7 = vsub.s32 5, %v1254_v31 }
  0xf7   : > { %363 = vrot.lane.b32.xlu1 %v356_v13, %s1014_s29  ;;  %v507_v13 = vsub.s32 6, %v1254_v31 }
  0xf8   : > { %386 = vrot.lane.b32.xlu0 %v379_v15, %s1015_s25 }
  0xf9   : > { %v423_v24 = vpop.permute.xlu1 %422 }
  0xfa   : > { %v402_v25 = vpop.permute.xlu0 %401 }
  0xfb   : > { %384 = vrot.lane.b32.xlu1 %v378_v16, %s1015_s25 }
  0xfc   : > { %438 = vperm.xlu0 %820, %v397_v5  }
  0xff   : > { %388 = vrot.lane.b32.xlu1 %v380_v17, %s1015_s25 }
 0x100   : > { %823 = vset.pattern.permute.xlu0 %v1016_v18 }
 0x101   : > { %486 = vperm.xlu0 %823, %v397_v5  }
 0x103   : > { %454 = vperm.xlu1 %821, %v397_v5  }
 0x105   : > { %826 = vset.pattern.permute.xlu0 %v1017_v19 }
 0x107   : > { %822 = vset.pattern.permute.xlu1 %v1018_v20 }
 0x108   : > { %470 = vperm.xlu1 %822, %v397_v5  }
 0x10c   : > { %824 = vset.pattern.permute.xlu1 %v1019_v21 }
 0x10d   : > { %502 = vperm.xlu1 %824, %v397_v5  }
 0x111   : > { %825 = vset.pattern.permute.xlu1 %v1017_v19 }
 0x112   : > { %518 = vperm.xlu1 %825, %v397_v5  }
 0x165   : > { %v362_v26 = vpop.permute.xlu1 %361  ;;  %v366_v28 = vpop.permute.xlu0 %365 }
 0x169   : > { %v364_v29 = vpop.permute.xlu1 %363 }
 0x16a   : > { %v368_v30 = vsel %vm367_vm0, %v362_v26, %v364_v29  ;;  %v387_v33 = vpop.permute.xlu0 %386  ;;  %v369_v36 = vsel %vm367_vm0, %v364_v29, %v366_v28 }
 0x16b   : > { %v372_v34 = vadd.f32 %v368_v30, %v346_v32  ;;  %v373_v41 = vadd.f32 %v369_v36, %v347_v39 }
 0x16d   : > { %v385_v35 = vpop.permute.xlu1 %384 }
 0x16e   : > { %v391_v37 = vsel %vm390_vm1, %v385_v35, %v387_v33 }
 0x16f   : > { %v395_v40 = vadd.f32 %v391_v37, %v372_v34 }
 0x171   : > { %v389_v42 = vpop.permute.xlu1 %388  ;;  %v407_v44 = vrot.slane %v395_v40, %v406_v38  ;;  %v428_v51 = vrot.slane %v395_v40, %v427_v46  ;;  %v444_v59 = vrot.slane %v395_v40, %v443_v50  ;;  %v460_v61 = vrot.slane %v395_v40, %v459_v53 }
 0x172   : > { %v392_v43 = vsel %vm390_vm1, %v387_v33, %v389_v42  ;;  %v476_v11 = vrot.slane %v395_v40, %v475_v62  ;;  %v492_v19 = vrot.slane %v395_v40, %v491_v7  ;;  %v508_v28 = vrot.slane %v395_v40, %v507_v13 }
 0x173   : > { %v396_v45 = vadd.f32 %v392_v43, %v373_v41  ;;  %v412_v48 = vmul.f32 %v407_v44, %v402_v25  ;;  %v433_v57 = vmul.f32 %v428_v51, %v423_v24 }
 0x175   : > { %v411_v47 = vrot.slane %v396_v45, %v406_v38  ;;  %v432_v52 = vrot.slane %v396_v45, %v427_v46  ;;  %v419_v54 = vadd.f32 %v417_v23, %v412_v48  ;;  %v448_v60 = vrot.slane %v396_v45, %v443_v50 }
 0x176   : > { %v464_v2 = vrot.slane %v396_v45, %v459_v53  ;;  %v480_v10 = vrot.slane %v396_v45, %v475_v62  ;;  %v496_v20 = vrot.slane %v396_v45, %v491_v7  ;;  %v512_v26 = vrot.slane %v396_v45, %v507_v13 }
 0x177   : > { %v413_v49 = vmul.f32 %v411_v47, %v402_v25  ;;  %v439_v56 = vpop.permute.xlu0 %438  ;;  %v434_v58 = vmul.f32 %v432_v52, %v423_v24  ;;  %v435_v63 = vadd.f32 %v433_v57, %v419_v54 }
 0x178   : > { %v449_v1 = vmul.f32 %v444_v59, %v439_v56  ;;  %v450_v4 = vmul.f32 %v448_v60, %v439_v56 }
 0x179   : > { %v420_v55 = vadd.f32 %v417_v23, %v413_v49  ;;  %v523_v23 = vsub.s32 7, %v1254_v31 }
 0x17a   : > { %v451_v8 = vadd.f32 %v449_v1, %v435_v63 }
 0x17b   : > { %v436_v0 = vadd.f32 %v434_v58, %v420_v55  ;;  %v528_v34 = vrot.slane %v396_v45, %v523_v23  ;;  %v524_v35 = vrot.slane %v395_v40, %v523_v23 }
 0x17c   : > { %v487_v18 = vpop.permute.xlu0 %486 }
 0x17d   : > { %v452_v9 = vadd.f32 %v450_v4, %v436_v0  ;;  %v497_v24 = vmul.f32 %v492_v19, %v487_v18  ;;  %v498_v25 = vmul.f32 %v496_v20, %v487_v18 }
 0x17e   : > { %v455_v3 = vpop.permute.xlu1 %454 }
 0x17f   : > { %v465_v5 = vmul.f32 %v460_v61, %v455_v3  ;;  %v466_v6 = vmul.f32 %v464_v2, %v455_v3 }
 0x181   : > { %v467_v14 = vadd.f32 %v465_v5, %v451_v8  ;;  %v468_v15 = vadd.f32 %v466_v6, %v452_v9 }
 0x183   : > { %v471_v12 = vpop.permute.xlu1 %470 }
 0x184   : > { %v481_v16 = vmul.f32 %v476_v11, %v471_v12  ;;  %v482_v17 = vmul.f32 %v480_v10, %v471_v12 }
 0x186   : > { %v483_v21 = vadd.f32 %v481_v16, %v467_v14  ;;  %v484_v22 = vadd.f32 %v482_v17, %v468_v15 }
 0x188   : > { %v503_v27 = vpop.permute.xlu1 %502  ;;  %v500_v29 = vadd.f32 %v498_v25, %v484_v22  ;;  %v499_v30 = vadd.f32 %v497_v24, %v483_v21 }
 0x189   : > { %v513_v32 = vmul.f32 %v508_v28, %v503_v27  ;;  %v514_v33 = vmul.f32 %v512_v26, %v503_v27 }
 0x18b   : > { %v515_v37 = vadd.f32 %v513_v32, %v499_v30  ;;  %v516_v38 = vadd.f32 %v514_v33, %v500_v29 }
 0x18d   : > { %v519_v36 = vpop.permute.xlu1 %518 }
 0x18e   : > { %v529_v39 = vmul.f32 %v524_v35, %v519_v36  ;;  %v530_v41 = vmul.f32 %v528_v34, %v519_v36  ;;  %542 = sbr.rel (!%p1163_p5) target bundleno = 429 (0x1ad), region = 52 }
 0x190   : > { %v531_v42 = vadd.f32 %v529_v39, %v515_v37  ;;  %v532_v31 = vadd.f32 %v530_v41, %v516_v38 }
 0x192   : > { %533 = vst [vmem:[%s317_s5] sm:$0xff] %v531_v42  ;;  %534 = vst [vmem:[%s317_s5 + $0x8] sm:$0xff] %v532_v31 }
 0x193   : > { %s1395_s23 = smov (!%p545_p12, %s544_s23), 2 }
 0x194   : > { %s1270_s17 = sshll.u32 %s1395_s23, 7 }
 0x195   : > { %s549_s6 = ssub.s32 256, %s1270_s17 }
 0x196   : > { %550 = vsyncadd %s536_s8, %s549_s6  ;;  %s1367_s21 = sld [smem:[#allocation14_spill]]  ;;  %p693_p0 = scmp.ne.s32.totalorder %s1270_s17, 0 }
 0x197   : > { %s558_s9 = sshll.u32 %s317_s5, 4  ;;  %s1368_s12 = sld [smem:[#allocation20_spill]]  ;;  %s559_s9 = int_to_ptr.vmem [resolvable:$true] %s558_s9 }
 0x198   : > { %s879_s11 = scalar_lea.vmem %s559_s9, %s1270_s17  ;;  %s1020_s30 = smov [#allocation8]  }
 0x199   : > { %p880_p5 = scmp.ne.s32.totalorder %s559_s9, %s879_s11  ;;  %s883_s29 = sshll.u32 %s1020_s30, 4  ;;  %s884_s29 = int_to_ptr.vmem [resolvable:$false] %s883_s29 }
 0x19a   : > { %s885_s25 = scalar_lea.vmem %s884_s29, 512  ;;  %p886_p2 = scmp.lt.s32.totalorder %s559_s9, %s884_s29 }
 0x19b   : > { %p881_p4 = pnand %p880_p5, %p693_p0  ;;  %p887_p1 = scmp.lt.s32.totalorder %s885_s25, %s879_s11 }
 0x19c   : > { %s707_s13 = smul.u32 3, %s1367_s21 }
 0x19d   : > { %p882_p8 = pneg %p881_p4  ;;  %p888_p6 = por %p887_p1, %p886_p2 }
 0x19e   : > { %s553_s15 = sadd.s32 %s707_s13, %s691_s14 }
 0x19f   : > { %s694_s18 = sshll.u32 %s553_s15, 7  ;;  %p889_p9 = pnand %p888_p6, %p882_p8 }
 0x1a0   : > { %s555_s16 = scalar_lea.hbm %s1368_s12, %s694_s18 }
 0x1a1   : > { %892 = shalt.err (!%p889_p9)
}
 0x1a2   : > { %s893_s5 = scalar_lea.hbm %s555_s16, %s1270_s17  ;;  %s897_s6 = scalar_lea.hbm %s1368_s12, 768 }
 0x1a3   : > { %p894_p7 = scmp.ne.s32.totalorder %s555_s16, %s893_s5  ;;  %p898_p13 = scmp.lt.s32.totalorder %s555_s16, %s1368_s12 }
 0x1a4   : > { %p899_p11 = scmp.lt.s32.totalorder %s897_s6, %s893_s5 }
 0x1a5   : > { %p895_p3 = pnand %p894_p7, %p693_p0 }
 0x1a6   : > { %p900_p12 = por %p899_p11, %p898_p13 }
 0x1a7   : > { %p896_p10 = pneg %p895_p3 }
 0x1a9   : > { %p901_p5 = pnand %p900_p12, %p896_p10 }
 0x1ab   : > { %904 = shalt.err (!%p901_p5)
}
 0x1ac   : > { %561 = dma.vmem_to_hbm [thread:$0]  (%p693_p0), %s559_s9, %s1270_s17, %s555_s16, %s536_s8  }
 0x1ad PF: > { %s1369_s15 = sld [smem:[#allocation12_spill]]  ;;  %p716_p4 = scmp.ge.s32.totalorder %s1006_s28, 2 }
 0x1ae   : > { %s1370_s18 = sld [smem:[#allocation18_spill]] }
 0x1b3   : > { %s570_s24 = sand.u32 1, %s1369_s15  }
 0x1b4   : > { %p1371_p8 = scmp.ne.s32.totalorder %s1370_s18, 0  ;;  %s571_s7 = scalar_lea.sflag [#allocation5], %s570_s24 }
 0x1b6   : > { %p713_p2 = pnand %p716_p4, %p1371_p8 }
 0x1b8   : > { %p714_p1 = pneg %p713_p2 }
 0x1ba   : > { %958 = dma.done.wait (%p714_p1), %s571_s7, 256  }
 0x1bb   : > { %960 = vsyncadd (%p714_p1), %s571_s7, 4294967040  ;;  %s24_s28 = sadd.s32 1, %s1006_s28   ;;  %s1372_s10 = sld [smem:[#allocation19_spill]] }
 0x1bc   : > { %p21_p6 = scmp.ge.s32.totalorder %s24_s28, 6   ;;  %s1373_s8 = sld [smem:[#allocation13_spill]] }
 0x1bd   : > { %s1374_s23 = sld [smem:[#allocation17_spill]]  ;;  %s1377_s18 = smov %s970_s19 }
 0x1be   : > { %s1375_s17 = sld [smem:[#allocation15_spill]]  ;;  %s1378_s19 = smov %s974_s20 }
 0x1bf   : > { %s1376_s9 = sld [smem:[#allocation16_spill]]  ;;  %s1380_s21 = smov %s982_s22 }
 0x1c0   : > { %s1382_s24 = smov %s998_s26  ;;  %s1383_s25 = smov %s1002_s27 }
 0x1c1   : > { %s1379_s20 = smov %s1372_s10  ;;  %23 = sbr.rel (!%p21_p6) target bundleno = 13 (0xd), region = 98 }
 0x1c2   : > { %s1381_s22 = smov %s1373_s8 }
 0x1c4   : > { %s1384_s26 = smov %s1375_s17 }
 0x1c5   : > { %s1385_s27 = smov %s1376_s9 }
 0x1c6   :  { %576 = vsyncpa [#allocation4], 1 }
 0x1c7   :  { %578 = vsyncpa [#allocation4 + $0x1], 1 }
 0x1c8   :  { %579 = vsyncpa [#allocation7], 1 }
 0x1c9   :  { %581 = vsyncpa [#allocation7 + $0x1], 1 }
 0x1ca   :  { %582 = vsyncpa [#allocation5], 1 }
 0x1cb   :  { %584 = vsyncpa [#allocation5 + $0x1], 1 }

</bundles_post_ra>
